<compile_context>
chip_gen: v7x
topology: tpu7x:2x2x1
jax: 0.10.0
libtpu: 0.0.40
codegen_flags: <defaults>
</compile_context>

<pallas_src>
import functools

import jax
import jax.numpy as jnp
from jax.experimental import pallas as pl
from jax.experimental.pallas import tpu as pltpu


def _lora_linear_kernel(x_ref, wt_ref, bias_ref, a_ref, b_ref, o_ref,
                        acc_ref, xa_ref, *, scaling):
    """One (i, j, k) grid step of  y = x @ Wt + bias + scaling * (x @ A) @ B.

    x_ref   : (tm, tk)  activation tile
    wt_ref  : (tk, tn)  base weight tile (already (K, N) layout)
    bias_ref: (1,  tn)  bias tile
    a_ref   : (tk, R)   LoRA down-projection tile (blocked by k only)
    b_ref   : (R,  tn)  LoRA up-projection tile  (blocked by j only)
    o_ref   : (tm, tn)  output tile
    acc_ref : (tm, tn)  f32 scratch accumulator for the base GEMM
    xa_ref  : (tm, R)   f32 scratch accumulator for x @ A
    """
    k = pl.program_id(2)

    @pl.when(k == 0)
    def _init():
        acc_ref[...] = jnp.zeros_like(acc_ref)
        xa_ref[...] = jnp.zeros_like(xa_ref)

    x = x_ref[...]
    # Base GEMM partial sum: (tm, tk) @ (tk, tn), f32 accumulation on the MXU.
    acc_ref[...] += jnp.dot(x, wt_ref[...], preferred_element_type=jnp.float32)
    # LoRA down-projection partial sum: (tm, tk) @ (tk, R) — tiny, rides along.
    xa_ref[...] += jnp.dot(x, a_ref[...], preferred_element_type=jnp.float32)

    @pl.when(k == pl.num_programs(2) - 1)
    def _finalize():
        # Scale the small (tm, R) intermediate instead of the (tm, tn) product.
        xa = (xa_ref[...] * scaling).astype(b_ref.dtype)
        lora = jnp.dot(xa, b_ref[...], preferred_element_type=jnp.float32)
        o_ref[...] = (acc_ref[...] + bias_ref[...] + lora).astype(o_ref.dtype)


def prepare_lora_weights(weight, bias, lora_a, lora_b, *, compute_dtype=None):
    """One-time weight preparation (do this at load time, NOT per call):
      - transpose the PyTorch (N, K) weight to lane-dense (K, N)
      - reshape bias to (1, N), kept in f32 for the f32 epilogue
      - optionally cast the MXU operands (W^T, A, B) to e.g. bf16 (v6e/v7x).
    """
    weight = jnp.asarray(weight)
    if compute_dtype is None:
        compute_dtype = weight.dtype
    wt = weight.T.astype(compute_dtype)                       # (K, N)
    bias2d = jnp.asarray(bias).reshape(1, -1).astype(jnp.float32)  # (1, N)
    a = jnp.asarray(lora_a).astype(compute_dtype)             # (K, R)
    b = jnp.asarray(lora_b).astype(compute_dtype)             # (R, N)
    return wt, bias2d, a, b


def lora_linear(x, wt, bias2d, lora_a, lora_b, *, rank, alpha,
                tm=256, tn=256, tk=512, vmem_limit_bytes=None):
    """x: (M, K); wt: (K, N) pre-transposed base weight; bias2d: (1, N);
    lora_a: (K, R); lora_b: (R, N). Returns (M, N) in x.dtype."""
    M, K = x.shape
    Kw, N = wt.shape
    assert Kw == K, "weight must already be in (K, N) layout (use prepare_lora_weights)"
    R = lora_a.shape[-1]
    assert R == rank and lora_b.shape == (R, N)
    scaling = alpha / rank

    # Clamp tiles to the problem and require even tiling (pad upstream otherwise).
    tm, tn, tk = min(tm, M), min(tn, N), min(tk, K)
    assert M % tm == 0 and N % tn == 0 and K % tk == 0, "dims must tile evenly"

    compute_dtype = wt.dtype
    x_c = x.astype(compute_dtype)

    grid = (M // tm, N // tn, K // tk)

    itemsize = jnp.dtype(compute_dtype).itemsize
    cost = pl.CostEstimate(
        flops=2 * M * N * K + 2 * M * K * R * (N // tn) + 2 * M * R * N,
        transcendentals=0,
        bytes_accessed=(M * K * itemsize * (N // tn)      # x re-read per N tile
                        + K * N * itemsize                # W^T
                        + N * 4                           # bias
                        + K * R * itemsize + R * N * itemsize  # A, B
                        + M * N * jnp.dtype(x.dtype).itemsize),  # output
    )

    kernel = functools.partial(_lora_linear_kernel, scaling=scaling)

    return pl.pallas_call(
        kernel,
        out_shape=jax.ShapeDtypeStruct((M, N), x.dtype),
        grid_spec=pltpu.PrefetchScalarGridSpec(
            num_scalar_prefetch=0,
            grid=grid,
            in_specs=[
                pl.BlockSpec((tm, tk), lambda i, j, k: (i, k)),   # x
                pl.BlockSpec((tk, tn), lambda i, j, k: (k, j)),   # W^T
                pl.BlockSpec((1, tn), lambda i, j, k: (0, j)),    # bias
                pl.BlockSpec((tk, R), lambda i, j, k: (k, 0)),    # A (k only)
                pl.BlockSpec((R, tn), lambda i, j, k: (0, j)),    # B (j only)
            ],
            out_specs=pl.BlockSpec((tm, tn), lambda i, j, k: (i, j)),
            scratch_shapes=[
                pltpu.VMEM((tm, tn), jnp.float32),   # base-GEMM accumulator
                pltpu.VMEM((tm, R), jnp.float32),    # x @ A accumulator
            ],
        ),
        compiler_params=pltpu.CompilerParams(
            dimension_semantics=("parallel", "parallel", "arbitrary"),
            vmem_limit_bytes=vmem_limit_bytes,
        ),
        cost_estimate=cost,
    )(x_c, wt, bias2d, lora_a, lora_b)


if __name__ == "__main__":
    # Small shapes consistent with the module's forward (2-D Linear input),
    # sized so the kernel exercises a real multi-step (i, j, k) grid.
    batch = 8
    in_features = 256
    out_features = 256
    rank = 4
    alpha = 8.0

    key = jax.random.PRNGKey(0)
    kx, kw, kb, ka, kbb = jax.random.split(key, 5)

    x = jax.random.normal(kx, (batch, in_features), dtype=jnp.float32)
    weight = jax.random.normal(kw, (out_features, in_features), dtype=jnp.float32) * 0.05
    bias = jax.random.normal(kb, (out_features,), dtype=jnp.float32) * 0.1
    # LoRALayer.__init__: A ~ N(0,1), B = zeros. Use a small random B so the
    # LoRA matmul path is numerically exercised (B=zeros would be a no-op).
    lora_a = jax.random.normal(ka, (in_features, rank), dtype=jnp.float32)
    lora_b = jax.random.normal(kbb, (rank, out_features), dtype=jnp.float32) * 0.05

    scaling = alpha / rank
    ref = x @ weight.T + bias + scaling * ((x @ lora_a) @ lora_b)

    # --- f32 MXU operands: tight check; grid = (1, 2, 2) with these tiles. ---
    wt32, b2d32, a32, b32 = prepare_lora_weights(
        weight, bias, lora_a, lora_b, compute_dtype=jnp.float32)
    out_f32 = lora_linear(x, wt32, b2d32, a32, b32, rank=rank, alpha=alpha,
                          tm=8, tn=128, tk=128)
    out_f32 = jax.block_until_ready(out_f32)
    assert out_f32.shape == (batch, out_features)
    assert jnp.allclose(out_f32, ref, atol=1e-4, rtol=1e-4), "f32 mismatch vs reference"

    # --- bf16 MXU operands (production config on v6e/v7x), f32 accumulate. ---
    wt16, b2d16, a16, b16 = prepare_lora_weights(
        weight, bias, lora_a, lora_b, compute_dtype=jnp.bfloat16)
    out_bf16 = lora_linear(x, wt16, b2d16, a16, b16, rank=rank, alpha=alpha,
                           tm=8, tn=128, tk=128)
    out_bf16 = jax.block_until_ready(out_bf16)
    assert jnp.allclose(out_bf16, ref, atol=1e-1, rtol=5e-2), "bf16 mismatch vs reference"

    print("KERNEL_OK")
</pallas_src>

<mosaic_0001>
module attributes {stable_mosaic.version = 11 : i64} {
  func.func @_lora_linear_kernel(%arg0: i32, %arg1: i32, %arg2: i32, %arg3: memref<8x128xf32, #tpu.memory_space<vmem>>, %arg4: memref<128x128xf32, #tpu.memory_space<vmem>>, %arg5: memref<1x128xf32, #tpu.memory_space<vmem>>, %arg6: memref<128x4xf32, #tpu.memory_space<vmem>>, %arg7: memref<4x128xf32, #tpu.memory_space<vmem>>, %arg8: memref<8x128xf32, #tpu.memory_space<vmem>>, %arg9: memref<8x128xf32, #tpu.memory_space<vmem>>, %arg10: memref<8x4xf32, #tpu.memory_space<vmem>>) attributes {dimension_semantics = [#tpu.dimension_semantics<parallel>, #tpu.dimension_semantics<parallel>, #tpu.dimension_semantics<arbitrary>], iteration_bounds = array<i64: 1, 2, 2>, scalar_prefetch = 0 : i64, scratch_operands = 2 : i64, tpu.core_type = #tpu.core_type<tc>, window_params = [{transform_indices = @transform_0, window_bounds = array<i64: 8, 128>}, {transform_indices = @transform_1, window_bounds = array<i64: 128, 128>}, {transform_indices = @transform_2, window_bounds = array<i64: 1, 128>}, {transform_indices = @transform_3, window_bounds = array<i64: 128, 4>}, {transform_indices = @transform_4, window_bounds = array<i64: 4, 128>}, {transform_indices = @transform_5, window_bounds = array<i64: 8, 128>}]} {
    %c0_i32 = arith.constant 0 : i32
    %0 = arith.cmpi eq, %arg2, %c0_i32 : i32
    %1 = arith.extui %0 : i1 to i32
    %c0_i32_0 = arith.constant 0 : i32
    %2 = arith.cmpi ne, %1, %c0_i32_0 : i32
    scf.if %2 {
      %cst_16 = arith.constant 0.000000e+00 : f32
      %17 = vector.broadcast %cst_16 : f32 to vector<8x128xf32>
      %c0_17 = arith.constant 0 : index
      %c0_18 = arith.constant 0 : index
      %18 = vector.load %arg9[%c0_17, %c0_18] : memref<8x128xf32, #tpu.memory_space<vmem>>, vector<8x128xf32>
      tpu.vector_store %arg9[%c0_17, %c0_18], %17 {strides = array<i32>} : memref<8x128xf32, #tpu.memory_space<vmem>>, vector<8x128xf32>,
      %cst_19 = arith.constant 0.000000e+00 : f32
      %19 = vector.broadcast %cst_19 : f32 to vector<8x4xf32>
      %c0_20 = arith.constant 0 : index
      %c0_21 = arith.constant 0 : index
      %20 = vector.load %arg10[%c0_20, %c0_21] : memref<8x4xf32, #tpu.memory_space<vmem>>, vector<8x4xf32>
      tpu.vector_store %arg10[%c0_20, %c0_21], %19 {strides = array<i32>} : memref<8x4xf32, #tpu.memory_space<vmem>>, vector<8x4xf32>,
    } else {
    }
    %c0 = arith.constant 0 : index
    %c0_1 = arith.constant 0 : index
    %3 = vector.load %arg3[%c0, %c0_1] : memref<8x128xf32, #tpu.memory_space<vmem>>, vector<8x128xf32>
    %c0_2 = arith.constant 0 : index
    %c0_3 = arith.constant 0 : index
    %4 = vector.load %arg9[%c0_2, %c0_3] : memref<8x128xf32, #tpu.memory_space<vmem>>, vector<8x128xf32>
    %c0_4 = arith.constant 0 : index
    %c0_5 = arith.constant 0 : index
    %5 = vector.load %arg4[%c0_4, %c0_5] : memref<128x128xf32, #tpu.memory_space<vmem>>, vector<128x128xf32>
    %cst = arith.constant dense<0.000000e+00> : vector<8x128xf32>
    %6 = tpu.matmul %3, %5, %cst {dimension_numbers = #tpu.dot_dimension_numbers<[1], [0], [0], [1], [0, 0, 1, 1], [], []>} : vector<8x128xf32>, vector<128x128xf32>, vector<8x128xf32> -> vector<8x128xf32>
    %7 = arith.addf %4, %6 : vector<8x128xf32>
    %c0_6 = arith.constant 0 : index
    %c0_7 = arith.constant 0 : index
    %8 = vector.load %arg9[%c0_6, %c0_7] : memref<8x128xf32, #tpu.memory_space<vmem>>, vector<8x128xf32>
    tpu.vector_store %arg9[%c0_6, %c0_7], %7 {strides = array<i32>} : memref<8x128xf32, #tpu.memory_space<vmem>>, vector<8x128xf32>,
    %c0_8 = arith.constant 0 : index
    %c0_9 = arith.constant 0 : index
    %9 = vector.load %arg10[%c0_8, %c0_9] : memref<8x4xf32, #tpu.memory_space<vmem>>, vector<8x4xf32>
    %c0_10 = arith.constant 0 : index
    %c0_11 = arith.constant 0 : index
    %10 = vector.load %arg6[%c0_10, %c0_11] : memref<128x4xf32, #tpu.memory_space<vmem>>, vector<128x4xf32>
    %cst_12 = arith.constant dense<0.000000e+00> : vector<8x4xf32>
    %11 = tpu.matmul %3, %10, %cst_12 {dimension_numbers = #tpu.dot_dimension_numbers<[1], [0], [0], [1], [0, 0, 1, 1], [], []>} : vector<8x128xf32>, vector<128x4xf32>, vector<8x4xf32> -> vector<8x4xf32>
    %12 = arith.addf %9, %11 : vector<8x4xf32>
    %c0_13 = arith.constant 0 : index
    %c0_14 = arith.constant 0 : index
    %13 = vector.load %arg10[%c0_13, %c0_14] : memref<8x4xf32, #tpu.memory_space<vmem>>, vector<8x4xf32>
    tpu.vector_store %arg10[%c0_13, %c0_14], %12 {strides = array<i32>} : memref<8x4xf32, #tpu.memory_space<vmem>>, vector<8x4xf32>,
    %c1_i32 = arith.constant 1 : i32
    %14 = arith.cmpi eq, %arg2, %c1_i32 : i32
    %15 = arith.extui %14 : i1 to i32
    %c0_i32_15 = arith.constant 0 : i32
    %16 = arith.cmpi ne, %15, %c0_i32_15 : i32
    scf.if %16 {
      %c0_16 = arith.constant 0 : index
      %c0_17 = arith.constant 0 : index
      %17 = vector.load %arg10[%c0_16, %c0_17] : memref<8x4xf32, #tpu.memory_space<vmem>>, vector<8x4xf32>
      %cst_18 = arith.constant 2.000000e+00 : f32
      %18 = vector.broadcast %cst_18 : f32 to vector<8x4xf32>
      %19 = arith.mulf %17, %18 : vector<8x4xf32>
      %c0_19 = arith.constant 0 : index
      %c0_20 = arith.constant 0 : index
      %20 = vector.load %arg7[%c0_19, %c0_20] : memref<4x128xf32, #tpu.memory_space<vmem>>, vector<4x128xf32>
      %cst_21 = arith.constant dense<0.000000e+00> : vector<8x128xf32>
      %21 = tpu.matmul %19, %20, %cst_21 {dimension_numbers = #tpu.dot_dimension_numbers<[1], [0], [0], [1], [0, 0, 1, 1], [], []>} : vector<8x4xf32>, vector<4x128xf32>, vector<8x128xf32> -> vector<8x128xf32>
      %c0_22 = arith.constant 0 : index
      %c0_23 = arith.constant 0 : index
      %22 = vector.load %arg9[%c0_22, %c0_23] : memref<8x128xf32, #tpu.memory_space<vmem>>, vector<8x128xf32>
      %c0_24 = arith.constant 0 : index
      %c0_25 = arith.constant 0 : index
      %23 = vector.load %arg5[%c0_24, %c0_25] : memref<1x128xf32, #tpu.memory_space<vmem>>, vector<1x128xf32>
      %24 = vector.broadcast %23 : vector<1x128xf32> to vector<8x128xf32>
      %25 = arith.addf %22, %24 : vector<8x128xf32>
      %26 = arith.addf %25, %21 : vector<8x128xf32>
      %c0_26 = arith.constant 0 : index
      %c0_27 = arith.constant 0 : index
      %27 = vector.load %arg8[%c0_26, %c0_27] : memref<8x128xf32, #tpu.memory_space<vmem>>, vector<8x128xf32>
      tpu.vector_store %arg8[%c0_26, %c0_27], %26 {strides = array<i32>} : memref<8x128xf32, #tpu.memory_space<vmem>>, vector<8x128xf32>,
    } else {
    }
    return
  }
  func.func @transform_0(%arg0: i32, %arg1: i32, %arg2: i32) -> (i32, i32) {
    %c0_i32 = arith.constant 0 : i32
    return %arg0, %arg2 : i32, i32
  }
  func.func @transform_1(%arg0: i32, %arg1: i32, %arg2: i32) -> (i32, i32) {
    %c0_i32 = arith.constant 0 : i32
    return %arg2, %arg1 : i32, i32
  }
  func.func @transform_2(%arg0: i32, %arg1: i32, %arg2: i32) -> (i32, i32) {
    %c0_i32 = arith.constant 0 : i32
    %c0_i32_0 = arith.constant 0 : i32
    return %c0_i32, %arg1 : i32, i32
  }
  func.func @transform_3(%arg0: i32, %arg1: i32, %arg2: i32) -> (i32, i32) {
    %c0_i32 = arith.constant 0 : i32
    %c0_i32_0 = arith.constant 0 : i32
    return %arg2, %c0_i32 : i32, i32
  }
  func.func @transform_4(%arg0: i32, %arg1: i32, %arg2: i32) -> (i32, i32) {
    %c0_i32 = arith.constant 0 : i32
    %c0_i32_0 = arith.constant 0 : i32
    return %c0_i32, %arg1 : i32, i32
  }
  func.func @transform_5(%arg0: i32, %arg1: i32, %arg2: i32) -> (i32, i32) {
    %c0_i32 = arith.constant 0 : i32
    return %arg0, %arg1 : i32, i32
  }
}

</mosaic_0001>

<bundles_post_ra>
// kernel: tpu_custom_call.1
= control target key start
LH: loop header
LB: loop body
LE: loop exit
PB: predicated region body
PF: predicated region fallthrough
CT: control target
= control target key end

     0   :  { %s1590_s0 = inlined_call_operand.vmem [shape: f32[8,256], index: 0, kind: input, shape index: {}]   ;;  %s1591_s1 = inlined_call_operand.hbm [shape: f32[256,256], index: 1, kind: input, shape index: {}]   ;;  %s1592_s2 = inlined_call_operand.vmem [shape: f32[1,256], index: 2, kind: input, shape index: {}]   ;;  %s1593_s3 = inlined_call_operand.vmem [shape: f32[256,4], index: 3, kind: input, shape index: {}]   ;;  %s1594_s4 = inlined_call_operand.vmem [shape: f32[4,256], index: 4, kind: input, shape index: {}]   ;;  %s1595_s5 = inlined_call_operand.hbm [shape: f32[8,256], index: 5, kind: output, shape index: {}]  }
   0x1   :  { %1605 = sst [smem:[#allocation18_spill]] %s1591_s1 }
   0x2   :  { %1606 = sst [smem:[#allocation19_spill]] %s1595_s5 }
   0x3   :  { %10 = vsyncpa [#allocation5], 0 }
   0x4   :  { %12 = vsyncpa [#allocation5 + $0x1], 0 }
   0x5   :  { %13 = vsyncpa [#allocation6], 0 }
   0x6   :  { %15 = vsyncpa [#allocation6 + $0x1], 0  ;;  %s1280_s18 = smov 0   ;;  %s1282_s19 = smov 0  }
   0x7   :  { %s1284_s20 = smov 0   ;;  %s1286_s21 = smov 0  }
   0x8   :  { %s1288_s22 = smov 0   ;;  %s1290_s23 = smov 0  }
   0x9   :  { %s1292_s24 = smov 0   ;;  %s1294_s25 = smov 0  }
   0xa   :  { %s1296_s26 = smov 0   ;;  %s1298_s27 = smov 0  }
   0xb   :  { %s1300_s28 = smov 0  }
   0xc LB: > { %1607 = sst [smem:[#allocation10_spill]] %s1213_s22  ;;  %s790_s29 = sadd.s32 4294967295, %s1237_s28   ;;  %s1237_s28 = sphi %s1300_s28, %s21_s28   ;;  %s1233_s27 = sphi %s1298_s27, %s1633_s27   ;;  %s1229_s26 = sphi %s1296_s26, %s1632_s26   ;;  %s1225_s25 = sphi %s1294_s25, %s1631_s25   ;;  %s1221_s24 = sphi %s1292_s24, %s1630_s24   ;;  %s1217_s23 = sphi %s1290_s23, %s1637_s23   ;;  %s1213_s22 = sphi %s1288_s22, %s1628_s22   ;;  %s1209_s21 = sphi %s1286_s21, %s1627_s21   ;;  %s1205_s20 = sphi %s1284_s20, %s1636_s20   ;;  %s1201_s19 = sphi %s1282_s19, %s1635_s19   ;;  %s1197_s18 = sphi %s1280_s18, %s1634_s18  }
   0xd   : > { %1608 = sst [smem:[#allocation11_spill]] %s1217_s23  ;;  %s791_s30 = sadd.s32 4294967294, %s1237_s28  }
   0xe   : > { %1609 = sst [smem:[#allocation12_spill]] %s1229_s26  ;;  %s33_s6 = sadd.s32 1, %s1229_s26 }
   0xf   : > { %1610 = sst [smem:[#allocation13_spill]] %s1233_s27  ;;  %s36_s7 = sadd.s32 1, %s1233_s27 }
  0x10   : > { %p34_p0 = scmp.ge.s32.totalorder %s33_s6, 2  ;;  %s77_s8 = sadd.s32 1, %s1217_s23 }
  0x11   : > { %p84_p1 = scmp.ne.s32.totalorder %s1217_s23, %s1213_s22  ;;  %p85_p2 = scmp.eq.s32.totalorder %s1237_s28, 0 }
  0x12   : > { %s1639_s6 = smov (%p34_p0, %s33_s6), 0  ;;  %s1641_s7 = smov (!%p34_p0, %s36_s7), %s1233_s27 }
  0x13   : > { %1611 = sst [smem:[#allocation14_spill]] %s1639_s6  ;;  %s72_s9 = ssub.s32 %s1229_s26, %s1639_s6 }
  0x14   : > { %p1346_p3 = por %p85_p2, %p84_p1  ;;  %p38_p4 = scmp.ge.s32.totalorder %s1641_s7, 2 }
  0x15   : > { %p90_p5 = scmp.ne.s32.totalorder %s1213_s22, %s1209_s21  ;;  %p91_p6 = scmp.eq.s32.totalorder %s790_s29, 0 }
  0x16   : > { %s183_s11 = sadd.s32 1, %s1205_s20  ;;  %s1643_s7 = smov (%p38_p4, %s1641_s7), 0 }
  0x17   : > { %1613 = sst [smem:[#allocation15_spill]] %s1643_s7  ;;  %p1354_p7 = por %p91_p6, %p90_p5 }
  0x18   : > { %p193_p8 = scmp.ne.s32.totalorder %s1205_s20, %s1201_s19  ;;  %s73_s13 = ssub.s32 %s1233_s27, %s1643_s7 }
  0x19   : > { %p194_p9 = scmp.eq.s32.totalorder %s790_s29, 3  ;;  %s74_s14 = sor.u32 %s73_s13, %s72_s9 }
  0x1a   : > { %p181_p10 = scmp.eq.s32.totalorder %s73_s13, 0  ;;  %p75_p11 = scmp.eq.s32.totalorder %s74_s14, 0 }
  0x1b   : > { %p1362_p12 = por %p194_p9, %p193_p8  ;;  %p199_p13 = scmp.ne.s32.totalorder %s1201_s19, %s1197_s18 }
  0x1c   : > { %s1367_s16 = scalar_select %p181_p10, %s1205_s20, %s183_s11  }
  0x1d   : > { %s1615_s15 = scalar_select %p1362_p12, 1, 0 }
  0x1e   : > { %1616 = sst [smem:[#allocation16_spill]] %s1367_s16  ;;  %p200_p0 = scmp.eq.s32.totalorder %s791_s30, 3 }
  0x1f   : > { %s1370_s17 = scalar_select %p75_p11, %s1217_s23, %s77_s8  }
  0x20   : > { %p986_p1 = scmp.lt.s32.totalorder %s1237_s28, 4  ;;  %p1375_p2 = por %p200_p0, %p199_p13 }
  0x21   : > { %1617 = sst [smem:[#allocation17_spill]] %s1370_s17  ;;  %s231_s29 = sand.u32 1, %s1217_s23  }
  0x22   : > { %s1618_s21 = scalar_select %p1375_p2, 1, 0 }
  0x23   : > { %s794_s9 = sshll.u32 %s231_s29, 7  ;;  %s814_s13 = sshll.u32 %s1229_s26, 5 }
  0x24   : > { %s241_s14 = sadd.s32 %s1233_s27, %s814_s13  ;;  %s235_s7 = scalar_lea.vmem [#allocation4], %s794_s9 }
  0x25   : > { %s244_s6 = sshll.u32 %s235_s7, 4  ;;  %s797_s5 = sshll.u32 %s241_s14, 7  ;;  %s1382_s6 = int_to_ptr.vmem [resolvable:$true] %s244_s6 }
  0x26   : > { %s1619_s1 = sld [smem:[#allocation18_spill]]  ;;  %p1391_p4 = pnand %p986_p1, %p1346_p3 }
  0x27   : > { %s1395_s7 = scalar_lea.sflag [#allocation5], %s231_s29 }
  0x28   : > { %p1087_p6 = pneg %p1391_p4 }
  0x2c   : > { %s1387_s8 = scalar_lea.hbm %s1619_s1, %s797_s5  ;;  %s1090_s16 = scalar_lea.hbm %s1619_s1, 8192 }
  0x2d   : > { %s1085_s9 = scalar_lea.hbm %s1387_s8, 2048  ;;  %p1091_p3 = scmp.lt.u32.totalorder %s1387_s8, %s1619_s1 }
  0x2e   : > { %p1086_p5 = scmp.ne.s32.totalorder %s1387_s8, %s1085_s9  ;;  %p1092_p10 = scmp.lt.u32.totalorder %s1090_s16, %s1085_s9 }
  0x2f   : > { %p1094_p13 = scmp.lt.u32.totalorder %s1085_s9, %s1387_s8 }
  0x30   : > { %p1088_p8 = pnand %p1087_p6, %p1086_p5  ;;  %p1093_p11 = por %p1092_p10, %p1091_p3 }
  0x32   : > { %p1089_p9 = pneg %p1088_p8  ;;  %p1095_p0 = por %p1094_p13, %p1093_p11 }
  0x34   : > { %p1096_p1 = pnand %p1095_p0, %p1089_p9 }
  0x36   : > { %1099 = shalt.err (!%p1096_p1)
}
  0x37   : > { %s1100_s29 = scalar_lea.vmem %s1382_s6, 2048  ;;  %s1239_s11 = smov [#allocation4]  }
  0x38   : > { %p1101_p5 = scmp.ne.s32.totalorder %s1382_s6, %s1100_s29  ;;  %s1105_s5 = sshll.u32 %s1239_s11, 4  ;;  %s1106_s5 = int_to_ptr.vmem [resolvable:$false] %s1105_s5 }
  0x39   : > { %s1107_s10 = scalar_lea.vmem %s1106_s5, 4096  ;;  %p1108_p12 = scmp.lt.s32.totalorder %s1382_s6, %s1106_s5 }
  0x3a   : > { %p1103_p8 = pnand %p1101_p5, %p1087_p6  ;;  %p1109_p3 = scmp.lt.s32.totalorder %s1107_s10, %s1100_s29 }
  0x3c   : > { %p1104_p2 = pneg %p1103_p8  ;;  %p1110_p10 = por %p1109_p3, %p1108_p12 }
  0x3e   : > { %p1111_p11 = pnand %p1110_p10, %p1104_p2 }
  0x40   : > { %1114 = shalt.err (!%p1111_p11)
}
  0x41   : > { %s1240_s9 = smov 256   ;;  %s1241_s16 = smov 128  }
  0x42   : > { %s1242_s13 = smov 8   ;;  %p798_p6 = scmp.ge.s32.totalorder %s1237_s28, 1 }
  0x43   : > { %981 = dma.hbm_to_vmem [thread:$0]  (!%p1391_p4), %s1387_s8, 2048, %s1382_s6, %s1395_s7, %s1240_s9, %s1241_s16, %s1242_s13  }
  0x44   : > { %p274_p9 = scmp.lt.s32.totalorder %s1237_s28, 5 }
  0x46   : > { %p275_p13 = pnand %p798_p6, %p274_p9 }
  0x47   : > { %s280_s14 = sand.u32 (!%p275_p13), 1, %s1213_s22  }
  0x48   : > { %278 = sbr.rel (%p275_p13) target bundleno = 599 (0x257), region = 40  ;;  %s799_s29 = sshll.u32 (!%p275_p13), %s280_s14, 7 }
  0x49   : > { %s281_s11 = scalar_lea.sflag (!%p275_p13), [#allocation5], %s280_s14  ;;  %s1426_s5 = scalar_lea.vmem (!%p275_p13), [#allocation4], %s799_s29 }
  0x4f   : > { %1188 = dma.done.wait (%p1354_p7), %s281_s11, 2048  }
  0x50   : > { %1190 = vsyncadd (%p1354_p7), %s281_s11, 4294965248  ;;  %s1600_s6 = sand.u32 1, %s1201_s19   ;;  %p333_p12 = scmp.lt.s32.totalorder %s1221_s24, 1 }
  0x51   : > { %s1436_s8 = sshll.u32 %s1600_s6, 3  ;;  %p340_p2 = scmp.lt.s32.totalorder %s1225_s25, 1 }
  0x52   : > { %s802_s30 = sshll.u32 %s1221_s24, 4  ;;  %s330_s9 = scalar_lea.vmem [#allocation7], %s1436_s8 }
  0x53   : > { %s334_s7 = scalar_select %p333_p12, %s1221_s24, 1 }
  0x54   : > { %s1442_s10 = scalar_select %p340_p2, %s1225_s25, 1 }
  0x55   : > { %s801_s12 = sshll.u32 %s334_s7, 3  ;;  %p344_p7 = scmp.lt.s32.totalorder %s802_s30, 31 }
  0x56   : > { %s1447_s13 = scalar_lea.vmem %s1590_s0, %s801_s12  ;;  %s342_s11 = scalar_lea.vmem %s1592_s2, %s1442_s10 }
  0x57   : > { %s1645_s30 = smov (!%p344_p7, %s802_s30), 31  ;;  %s804_s6 = sshll.u32 %s1442_s10, 2 }
  0x58   : > { %s803_s1 = sshll.u32 %s1645_s30, 3  ;;  %s1457_s17 = scalar_lea.vmem %s1594_s4, %s804_s6 }
  0x59   : > { %s1462_s22 = scalar_lea.vmem %s1593_s3, %s803_s1  ;;  %p805_p4 = scmp.ne.s32.totalorder %s1221_s24, 0 }
  0x5a   : > { %vm358_vm0 = vcmask (!%p805_p4), 31744   ;;  %v1243_v0 = vmov (!%p805_p4), 0.0  }
  0x5b   : > { %356 = sbr.rel (%p805_p4) target bundleno = 98 (0x62), region = 48  ;;  %357 = vst [vmem:[#allocation2] sm:$0xff] (!%p805_p4), %v1243_v0  ;;  %359 = vst.msk [vmem:[#allocation3] sm:$0xff] (!%p805_p4), %vm358_vm0, %v1243_v0 }
  0x62 PF: > { %v362_v1 = vld [vmem:[%s1426_s5] sm:$0xff]  ;;  %v363_v2 = vld [vmem:[%s1426_s5 + $0x8] sm:$0xff]  ;;  %v451_v3 = vld [vmem:[%s1462_s22] sm:$0xff]  ;;  %v1244_v4 = vmov 0.0|0.0   ;;  %vm1245_vm1 = vmmov 0   ;;  %v1246_v12 = vmov 0.0  }
  0x63   : > { %926 = vmatprep.subr.bf16.mxu0 %v1244_v4  ;;  %950 = vmatprep.subr.bf16.mxu1 %v1244_v4  ;;  %v927_v5 = vpack.c.bf16 %v363_v2, %v362_v1  ;;  %v452_v6 = vld [vmem:[%s1462_s22 + $0x8] sm:$0xff]  ;;  %v364_v7 = vld [vmem:[%s1426_s5 + $0x10] sm:$0xff]  ;;  %v453_v10 = vld [vmem:[%s1462_s22 + $0x10] sm:$0xff]  ;;  %vm538_vm2 = vcmask 31744   ;;  %p806_p0 = scmp.ne.s32.totalorder %s1221_s24, 1 }
  0x64   : > { %v365_v8 = vld [vmem:[%s1426_s5 + $0x18] sm:$0xff]  ;;  %v951_v9 = vpack.c.bf16 %v452_v6, %v451_v3  ;;  %v454_v11 = vld [vmem:[%s1462_s22 + $0x18] sm:$0xff]  ;;  %883 = vmatprep.mubr.msk.f32.mxu0 %vm1245_vm1, %v1246_v12  ;;  %918 = vmatprep.mubr.msk.f32.mxu1 %vm1245_vm1, %v1246_v12  ;;  %v366_v15 = vld [vmem:[%s1426_s5 + $0x20] sm:$0xff]  ;;  %vm550_vm3 = vcmask (!%p806_p0), 1043456   ;;  %v1247_v62 = vmov (!%p806_p0), 0.0   ;;  %vm1248_vm4 = vmmov (!%p806_p0), 0  }
  0x65   : > { %928 = vmatpush3.bf16.msra.mxu0 %v927_v5  ;;  %v930_v13 = vpack.c.bf16 %v365_v8, %v364_v7  ;;  %v954_v14 = vpack.c.bf16 %v454_v11, %v453_v10  ;;  %v367_v16 = vld [vmem:[%s1426_s5 + $0x28] sm:$0xff]  ;;  %v455_v17 = vld [vmem:[%s1462_s22 + $0x20] sm:$0xff]  ;;  %v456_v18 = vld [vmem:[%s1462_s22 + $0x28] sm:$0xff] }
  0x66   : > { %952 = vmatpush3.bf16.msra.mxu1 %v951_v9  ;;  %929 = vmatprep.subr.bf16.mxu0 %v1244_v4  ;;  %v933_v19 = vpack.c.bf16 %v367_v16, %v366_v15  ;;  %v957_v20 = vpack.c.bf16 %v456_v18, %v455_v17  ;;  %v368_v21 = vld [vmem:[%s1426_s5 + $0x30] sm:$0xff]  ;;  %v369_v22 = vld [vmem:[%s1426_s5 + $0x38] sm:$0xff]  ;;  %v457_v23 = vld [vmem:[%s1462_s22 + $0x30] sm:$0xff] }
  0x67   : > { %953 = vmatprep.subr.bf16.mxu1 %v1244_v4  ;;  %v458_v24 = vld [vmem:[%s1462_s22 + $0x38] sm:$0xff]  ;;  %v936_v25 = vpack.c.bf16 %v369_v22, %v368_v21  ;;  %v370_v27 = vld [vmem:[%s1426_s5 + $0x40] sm:$0xff]  ;;  %v459_v29 = vld [vmem:[%s1462_s22 + $0x40] sm:$0xff] }
  0x68   : > { %v960_v26 = vpack.c.bf16 %v458_v24, %v457_v23  ;;  %v371_v28 = vld [vmem:[%s1426_s5 + $0x48] sm:$0xff]  ;;  %v460_v30 = vld [vmem:[%s1462_s22 + $0x48] sm:$0xff]  ;;  %v372_v33 = vld [vmem:[%s1426_s5 + $0x50] sm:$0xff] }
  0x69   : > { %931 = vmatpush3.bf16.msra.mxu0 %v930_v13  ;;  %v939_v31 = vpack.c.bf16 %v371_v28, %v370_v27  ;;  %v963_v32 = vpack.c.bf16 %v460_v30, %v459_v29  ;;  %v373_v34 = vld [vmem:[%s1426_s5 + $0x58] sm:$0xff]  ;;  %v461_v35 = vld [vmem:[%s1462_s22 + $0x50] sm:$0xff]  ;;  %v462_v36 = vld [vmem:[%s1462_s22 + $0x58] sm:$0xff] }
  0x6a   : > { %955 = vmatpush3.bf16.msra.mxu1 %v954_v14  ;;  %932 = vmatprep.subr.bf16.mxu0 %v1244_v4  ;;  %v942_v37 = vpack.c.bf16 %v373_v34, %v372_v33  ;;  %v966_v38 = vpack.c.bf16 %v462_v36, %v461_v35  ;;  %v374_v39 = vld [vmem:[%s1426_s5 + $0x60] sm:$0xff]  ;;  %v375_v40 = vld [vmem:[%s1426_s5 + $0x68] sm:$0xff]  ;;  %v463_v41 = vld [vmem:[%s1462_s22 + $0x60] sm:$0xff] }
  0x6b   : > { %956 = vmatprep.subr.bf16.mxu1 %v1244_v4  ;;  %v464_v42 = vld [vmem:[%s1462_s22 + $0x68] sm:$0xff]  ;;  %v945_v43 = vpack.c.bf16 %v375_v40, %v374_v39  ;;  %v376_v45 = vld [vmem:[%s1426_s5 + $0x70] sm:$0xff]  ;;  %v465_v47 = vld [vmem:[%s1462_s22 + $0x70] sm:$0xff] }
  0x6c   : > { %v969_v44 = vpack.c.bf16 %v464_v42, %v463_v41  ;;  %v377_v46 = vld [vmem:[%s1426_s5 + $0x78] sm:$0xff]  ;;  %v466_v48 = vld [vmem:[%s1462_s22 + $0x78] sm:$0xff]  ;;  %v360_v51 = vld [vmem:[%s1447_s13] sm:$0xff] }
  0x6d   : > { %934 = vmatpush3.bf16.msra.mxu0 %v933_v19  ;;  %v948_v49 = vpack.c.bf16 %v377_v46, %v376_v45  ;;  %v972_v50 = vpack.c.bf16 %v466_v48, %v465_v47  ;;  %v361_v52 = vld [vmem:[#allocation2] sm:$0xff]  ;;  %v450_v53 = vld [vmem:[#allocation3] sm:$0xff] }
  0x6e   : > { %958 = vmatpush3.bf16.msra.mxu1 %v957_v20  ;;  %935 = vmatprep.subr.bf16.mxu0 %v1244_v4  ;;  %v546_v60 = vld [vmem:[%s1457_s17] sm:$0xf] (!%p806_p0) }
  0x6f   : > { %959 = vmatprep.subr.bf16.mxu1 %v1244_v4  ;;  %v809_v1 = vld [vmem:[%s342_s11] ss:$0 sm:$0xff] (!%p806_p0) }
  0x71   : > { %937 = vmatpush3.bf16.msra.mxu0 %v936_v25 }
  0x72   : > { %961 = vmatpush3.bf16.msra.mxu1 %v960_v26  ;;  %938 = vmatprep.subr.bf16.mxu0 %v1244_v4 }
  0x73   : > { %962 = vmatprep.subr.bf16.mxu1 %v1244_v4 }
  0x75   : > { %940 = vmatpush3.bf16.msra.mxu0 %v939_v31 }
  0x76   : > { %964 = vmatpush3.bf16.msra.mxu1 %v963_v32  ;;  %941 = vmatprep.subr.bf16.mxu0 %v1244_v4 }
  0x77   : > { %965 = vmatprep.subr.bf16.mxu1 %v1244_v4 }
  0x79   : > { %943 = vmatpush3.bf16.msra.mxu0 %v942_v37 }
  0x7a   : > { %967 = vmatpush3.bf16.msra.mxu1 %v966_v38  ;;  %944 = vmatprep.subr.bf16.mxu0 %v1244_v4 }
  0x7b   : > { %968 = vmatprep.subr.bf16.mxu1 %v1244_v4 }
  0x7d   : > { %946 = vmatpush3.bf16.msra.mxu0 %v945_v43 }
  0x7e   : > { %970 = vmatpush3.bf16.msra.mxu1 %v969_v44  ;;  %947 = vmatprep.subr.bf16.mxu0 %v1244_v4 }
  0x7f   : > { %971 = vmatprep.subr.bf16.mxu1 %v1244_v4 }
  0x81   : > { %949 = vmatpush3.bf16.msra.mxu0 %v948_v49 }
  0x82   : > { %973 = vmatpush3.bf16.msra.mxu1 %v972_v50  ;;  %921 = vmatprep.subr.mxu0 (!%p806_p0), %v1247_v62 }
  0x84   : > { %884 = vmatmul.mubr.f32.vlgmr.msra.gmra.mrb[0].mxu0 %v360_v51 }
  0x85   : > { %919 = vmatmul.mubr.f32.vlgmr.msra.gmra.mrb[0].mxu1 %v360_v51  ;;  %923 = vmatprep.mubr.msk.f32.mxu0 (!%p806_p0), %vm1248_vm4, %v1247_v62 }
  0x86   : > { %922 = vmatpush3.msk.msra.mxu0 (!%p806_p0), %vm550_vm3, %v546_v60 }
 0x155   : > { %543 = sbr.rel (%p806_p0) target bundleno = 572 (0x23c), region = 52 }
 0x157   : > { %v444_v54 = vpop.f32.mrb[0].mxu0 }
 0x158   : > { %v448_v55 = vadd.f32 %v444_v54, %v361_v52  ;;  %v533_v56 = vpop.f32.mrb[0].mxu1  ;;  %v885_v57 = vpop.f32.mrb[1].mxu0 }
 0x159   : > { %v537_v58 = vadd.f32 %v533_v56, %v450_v53  ;;  %v920_v59 = vpop.f32.mrb[1].mxu1 }
 0x15a   : > { %449 = vst [vmem:[#allocation2] sm:$0xff] %v448_v55 }
 0x15b   : > { %539 = vst.msk [vmem:[#allocation3] sm:$0xff] %vm538_vm2, %v537_v58 }
 0x161   : > { %v624_v0 = vld [vmem:[#allocation2] sm:$0xff] }
 0x162   : > { %v544_v61 = vld [vmem:[#allocation3] sm:$0xff]  ;;  %v632_v2 = vadd.f32 %v809_v1, %v624_v0 }
 0x163   : > { %v545_v63 = vmul.f32 2.0, %v544_v61 }
 0x165   : > { %924 = vmatmul.mubr.msk.f32.vlgmr.msra.gmra.mrb[0].mxu0 %vm538_vm2, %v545_v63 }
 0x238   : > { %v620_v3 = vpop.f32.mrb[0].mxu0 }
 0x239   : > { %v633_v4 = vadd.f32 %v632_v2, %v620_v3  ;;  %v925_v5 = vpop.f32.mrb[1].mxu0 }
 0x23b   : > { %634 = vst [vmem:[%s330_s9] sm:$0xff] %v633_v4 }
 0x23c PF: > { %s811_s23 = sshll.u32 %s1225_s25, 7  ;;  %s1621_s27 = sld [smem:[#allocation19_spill]] }
 0x23d   : > { %s651_s6 = sshll.u32 %s330_s9, 4  ;;  %s1623_s30 = sand.u32 1, %s1201_s19   ;;  %s652_s6 = int_to_ptr.vmem [resolvable:$true] %s651_s6 }
 0x23e   : > { %s636_s10 = scalar_lea.sflag [#allocation6], %s1623_s30  ;;  %s1115_s12 = scalar_lea.vmem %s652_s6, 128 }
 0x23f   : > { %p1116_p1 = scmp.ne.s32.totalorder %s652_s6, %s1115_s12  ;;  %p1624_p5 = scmp.ne.s32.totalorder %s1615_s15, 0 }
 0x240   : > { %s1249_s16 = smov [#allocation7]  }
 0x241   : > { %p1117_p8 = pnand %p1116_p1, %p1624_p5  ;;  %s1119_s13 = sshll.u32 %s1249_s16, 4  ;;  %s1120_s13 = int_to_ptr.vmem [resolvable:$false] %s1119_s13 }
 0x242   : > { %s1622_s17 = smov %s1621_s27  ;;  %s1530_s5 = scalar_lea.hbm %s1621_s27, %s811_s23 }
 0x243   : > { %p1118_p3 = pneg %p1117_p8  ;;  %s1121_s14 = scalar_lea.vmem %s1120_s13, 256 }
 0x244   : > { %p1122_p10 = scmp.lt.s32.totalorder %s652_s6, %s1120_s13  ;;  %p1123_p11 = scmp.lt.s32.totalorder %s1121_s14, %s1115_s12 }
 0x246   : > { %p1124_p6 = por %p1123_p11, %p1122_p10 }
 0x248   : > { %p1125_p9 = pnand %p1124_p6, %p1118_p3 }
 0x24a   : > { %1128 = shalt.err (!%p1125_p9)
}
 0x24b   : > { %s1129_s25 = scalar_lea.hbm %s1530_s5, 128  ;;  %s1133_s11 = scalar_lea.hbm %s1622_s17, 256 }
 0x24c   : > { %p1130_p13 = scmp.ne.s32.totalorder %s1530_s5, %s1129_s25  ;;  %p1134_p7 = scmp.lt.u32.totalorder %s1530_s5, %s1622_s17 }
 0x24d   : > { %p1135_p4 = scmp.lt.u32.totalorder %s1133_s11, %s1129_s25  ;;  %p1137_p1 = scmp.lt.u32.totalorder %s1129_s25, %s1530_s5 }
 0x24e   : > { %p1131_p12 = pnand %p1130_p13, %p1624_p5 }
 0x24f   : > { %p1136_p0 = por %p1135_p4, %p1134_p7 }
 0x250   : > { %p1132_p2 = pneg %p1131_p12 }
 0x251   : > { %p1138_p8 = por %p1137_p1, %p1136_p0 }
 0x253   : > { %p1139_p3 = pnand %p1138_p8, %p1132_p2 }
 0x255   : > { %1142 = shalt.err (!%p1139_p3)
}
 0x256   : > { %976 = dma.vmem_to_hbm [thread:$0]  (%p1624_p5), %s652_s6, 128, %s1530_s5, %s636_s10  }
 0x257 PF: > { %p987_p10 = scmp.ge.s32.totalorder %s1237_s28, 2  ;;  %s663_s1 = sand.u32 1, %s1197_s18  }
 0x258   : > { %p1625_p11 = scmp.ne.s32.totalorder %s1618_s21, 0  ;;  %s664_s22 = scalar_lea.sflag [#allocation6], %s663_s1 }
 0x25a   : > { %p983_p6 = pnand %p987_p10, %p1625_p11 }
 0x25c   : > { %1192 = dma.done.wait (!%p983_p6), %s664_s22, 128  }
 0x25d   : > { %1194 = vsyncadd (!%p983_p6), %s664_s22, 4294967168  ;;  %s21_s28 = sadd.s32 1, %s1237_s28   ;;  %s1626_s23 = sld [smem:[#allocation16_spill]] }
 0x25e   : > { %p18_p9 = scmp.ge.s32.totalorder %s21_s28, 6   ;;  %s1627_s21 = sld [smem:[#allocation10_spill]] }
 0x25f   : > { %s1628_s22 = sld [smem:[#allocation11_spill]]  ;;  %s1629_s15 = sld [smem:[#allocation17_spill]] }
 0x260   : > { %s1630_s24 = sld [smem:[#allocation12_spill]]  ;;  %s1631_s25 = sld [smem:[#allocation13_spill]] }
 0x261   : > { %s1632_s26 = sld [smem:[#allocation14_spill]]  ;;  %s1633_s27 = sld [smem:[#allocation15_spill]] }
 0x262   : > { %s1634_s18 = smov %s1201_s19  ;;  %s1635_s19 = smov %s1205_s20 }
 0x263   : > { %s1636_s20 = smov %s1626_s23  ;;  %20 = sbr.rel (!%p18_p9) target bundleno = 12 (0xc), region = 105 }
 0x265   : > { %s1637_s23 = smov %s1629_s15 }
 0x26a   :  { %669 = vsyncpa [#allocation5], 1 }
 0x26b   :  { %671 = vsyncpa [#allocation5 + $0x1], 1 }
 0x26c   :  { %672 = vsyncpa [#allocation6], 1 }
 0x26d   :  { %674 = vsyncpa [#allocation6 + $0x1], 1 }

</bundles_post_ra>
